<compile_context>
chip_gen: v7x
topology: tpu7x:2x2x1
jax: 0.10.0
libtpu: 0.0.40
codegen_flags: <defaults>
</compile_context>

<pallas_src>
import functools

import jax
import jax.numpy as jnp
from jax.experimental import pallas as pl
from jax.experimental.pallas import tpu as pltpu


def _round_up(x, m):
    return ((x + m - 1) // m) * m


def _cdiv(a, b):
    return -(-a // b)


# ----------------------------------------------------------------------------
# Fused Pallas kernel:  BatchLinear -> LayerNorm(out_ch, no affine) -> ReLU
# ----------------------------------------------------------------------------
def _batch_linear_ln_relu_kernel(x_ref, w_ref, b_ref, o_ref, *, eps,
                                 compute_dtype):
    # x_ref: (tS, in_ch)       f32 (cast to compute_dtype in-kernel)
    # w_ref: (in_ch, out_ch)   pre-transposed, compute_dtype
    # b_ref: (1, out_ch)       f32
    # o_ref: (tS, out_ch)      f32
    x = x_ref[...].astype(compute_dtype)   # cast hides under the DMA
    w = w_ref[...]

    # MXU matmul with f32 accumulation; out_ch on the lane axis (no transpose).
    acc = jnp.dot(x, w, preferred_element_type=jnp.float32) + b_ref[...]

    # Centered two-pass LayerNorm over out_ch (no affine).
    mean = jnp.mean(acc, axis=-1, keepdims=True)
    c = acc - mean
    var = jnp.mean(c * c, axis=-1, keepdims=True)
    y = c * jax.lax.rsqrt(var + eps)

    o_ref[...] = jnp.maximum(y, 0.0).astype(o_ref.dtype)


def _choose_tile_s(S, B, tile_s):
    # Largest tile (multiple of 8) up to tile_s; keep >= 2 total grid blocks so
    # v7x's two TensorCores can both be used when the problem allows it.
    tS = max(8, min(_round_up(tile_s, 8), _round_up(S, 8)))
    if B * _cdiv(S, tS) < 2 and S > 8:
        tS = max(8, _round_up(_cdiv(S, 2), 8))
    return tS


def batch_linear_ln_relu(x, weights, biases, *, tile_s=4096,
                         compute_dtype=jnp.bfloat16, eps=1e-5):
    """Apply the HyperLayer-predicted module to x.

    x:       (B, S, in_ch)        f32
    weights: (B, out_ch, in_ch)   (PyTorch BatchLinear layout)
    biases:  (B, 1, out_ch)
    returns: (B, S, out_ch)       f32
    """
    B, S, in_ch = x.shape
    _, out_ch, _ = weights.shape
    assert weights.shape == (B, out_ch, in_ch)
    assert biases.shape == (B, 1, out_ch)

    # Pre-transpose weights once (no in-kernel .T); they are tiny and reused
    # across every S tile of a batch, so the wrapper-side prep is fine.
    w_t = jnp.swapaxes(weights, -1, -2).astype(compute_dtype)  # (B, in_ch, out_ch)
    b_f = biases.astype(jnp.float32)                           # (B, 1, out_ch)

    tS = _choose_tile_s(S, B, tile_s)
    grid = (B, _cdiv(S, tS))

    kernel = functools.partial(_batch_linear_ln_relu_kernel,
                               eps=eps, compute_dtype=compute_dtype)

    out_bytes = B * S * out_ch * 4
    cost = pl.CostEstimate(
        flops=2 * B * S * in_ch * out_ch + 8 * B * S * out_ch,
        transcendentals=B * S,
        bytes_accessed=(x.size * x.dtype.itemsize
                        + w_t.size * w_t.dtype.itemsize
                        + b_f.size * 4
                        + out_bytes),
    )

    out = pl.pallas_call(
        kernel,
        out_shape=jax.ShapeDtypeStruct((B, S, out_ch), jnp.float32),
        grid=grid,
        in_specs=[
            # x tile for (batch b, S-tile s); leading size-1 dim squeezed.
            pl.BlockSpec((pl.Squeezed(), tS, in_ch), lambda b, s: (b, s, 0)),
            # per-batch weights/bias: constant block index along the inner S
            # axis, so their DMA is skipped across consecutive S tiles.
            pl.BlockSpec((pl.Squeezed(), in_ch, out_ch), lambda b, s: (b, 0, 0)),
            pl.BlockSpec((pl.Squeezed(), 1, out_ch), lambda b, s: (b, 0, 0)),
        ],
        out_specs=pl.BlockSpec((pl.Squeezed(), tS, out_ch),
                               lambda b, s: (b, s, 0)),
        compiler_params=pltpu.CompilerParams(
            dimension_semantics=("parallel", "parallel")),
        cost_estimate=cost,
    )(x, w_t, b_f)

    return out


# ----------------------------------------------------------------------------
# Hypernetwork (FCBlock / HyperLinear) — tiny per-scene MLP, plain JAX.
# ----------------------------------------------------------------------------
def _kaiming_normal(key, shape, fan_in):
    return jax.random.normal(key, shape, jnp.float32) * jnp.sqrt(2.0 / fan_in)


def init_hyper_layer_params(key, in_ch, out_ch, hyper_in_ch,
                            hyper_num_hidden_layers, hyper_hidden_ch):
    """Hypernetwork params: hyper_in_ch -> hidden... -> in_ch*out_ch + out_ch."""
    n_hidden = 1 + hyper_num_hidden_layers
    keys = jax.random.split(key, n_hidden + 1)
    hidden = []
    prev = hyper_in_ch
    for i in range(n_hidden):
        w = _kaiming_normal(keys[i], (prev, hyper_hidden_ch), prev)
        b = jnp.zeros((hyper_hidden_ch,), jnp.float32)
        hidden.append((w, b))
        prev = hyper_hidden_ch
    out_features = in_ch * out_ch + out_ch
    # last_hyper_layer_init: kaiming_normal (fan_in, relu) scaled by 0.1.
    w_out = _kaiming_normal(keys[-1], (prev, out_features), prev) * 0.1
    b_out = jnp.zeros((out_features,), jnp.float32)
    return {"hidden": hidden, "out": (w_out, b_out)}


def _layer_norm(x, eps=1e-5):
    mean = jnp.mean(x, axis=-1, keepdims=True)
    var = jnp.mean(jnp.square(x - mean), axis=-1, keepdims=True)
    return (x - mean) * jax.lax.rsqrt(var + eps)


def fc_block_forward(params, h):
    # TODO(synk): FCBlock's definition is not included in the provided spec;
    # this follows its reference implementation (FCLayer = Linear -> LayerNorm
    # -> ReLU for input/hidden layers, plain final Linear for outermost_linear).
    for w, b in params["hidden"]:
        h = jnp.maximum(_layer_norm(h @ w + b), 0.0)
    w, b = params["out"]
    return h @ w + b


def hyper_layer_forward(params, hyper_input, x, *, in_ch, out_ch,
                        compute_dtype=jnp.bfloat16):
    """HyperLayer: predict per-batch (W, b) from hyper_input, then apply the
    predicted Sequential(BatchLinear, LayerNorm(no affine), ReLU) to x."""
    hypo = fc_block_forward(params, hyper_input)          # (B, in_ch*out_ch+out_ch)
    B = hypo.shape[0]
    weights = hypo[..., :in_ch * out_ch].reshape(B, out_ch, in_ch)
    biases = hypo[..., in_ch * out_ch:].reshape(B, 1, out_ch)
    return batch_linear_ln_relu(x, weights, biases, compute_dtype=compute_dtype)


# ----------------------------------------------------------------------------
if __name__ == "__main__":
    in_ch, out_ch = 32, 16
    hyper_in_ch, hyper_num_hidden_layers, hyper_hidden_ch = 8, 1, 32
    B, S = 2, 8

    key = jax.random.PRNGKey(0)
    k_p, k_h, k_x = jax.random.split(key, 3)

    params = init_hyper_layer_params(k_p, in_ch, out_ch, hyper_in_ch,
                                     hyper_num_hidden_layers, hyper_hidden_ch)
    hyper_input = jax.random.normal(k_h, (B, hyper_in_ch), jnp.float32)
    x = jax.random.normal(k_x, (B, S, in_ch), jnp.float32)

    out = hyper_layer_forward(params, hyper_input, x, in_ch=in_ch, out_ch=out_ch)
    out = jax.block_until_ready(out)

    # Pure-JAX reference of the PyTorch semantics, mirroring the bf16 rounding
    # the kernel applies to the matmul inputs (accumulation stays f32).
    hypo = fc_block_forward(params, hyper_input)
    w_ref = hypo[..., :in_ch * out_ch].reshape(B, out_ch, in_ch)
    b_ref = hypo[..., in_ch * out_ch:].reshape(B, 1, out_ch)
    x_r = x.astype(jnp.bfloat16).astype(jnp.float32)
    w_r = w_ref.astype(jnp.bfloat16).astype(jnp.float32)
    y = jnp.einsum("bsi,boi->bso", x_r, w_r) + b_ref      # BatchLinear
    ref = jnp.maximum(_layer_norm(y), 0.0)                # LayerNorm + ReLU

    assert out.shape == (B, S, out_ch)
    assert jnp.allclose(out, ref, atol=2e-3, rtol=2e-3), "mismatch vs reference"

    print("KERNEL_OK")
</pallas_src>

<mosaic_0001>
module attributes {stable_mosaic.version = 11 : i64} {
  func.func @_batch_linear_ln_relu_kernel(%arg0: i32, %arg1: i32, %arg2: memref<1x8x32xf32, #tpu.memory_space<vmem>>, %arg3: memref<1x32x16xbf16, #tpu.memory_space<vmem>>, %arg4: memref<1x1x16xf32, #tpu.memory_space<vmem>>, %arg5: memref<1x8x16xf32, #tpu.memory_space<vmem>>) attributes {dimension_semantics = [#tpu.dimension_semantics<parallel>, #tpu.dimension_semantics<parallel>], iteration_bounds = array<i64: 2, 1>, scalar_prefetch = 0 : i64, scratch_operands = 0 : i64, tpu.core_type = #tpu.core_type<tc>, window_params = [{transform_indices = @transform_0, window_bounds = array<i64: 1, 8, 32>}, {transform_indices = @transform_1, window_bounds = array<i64: 1, 32, 16>}, {transform_indices = @transform_2, window_bounds = array<i64: 1, 1, 16>}, {transform_indices = @transform_3, window_bounds = array<i64: 1, 8, 16>}]} {
    %c0 = arith.constant 0 : index
    %c0_0 = arith.constant 0 : index
    %c0_1 = arith.constant 0 : index
    %0 = vector.load %arg2[%c0, %c0_0, %c0_1] : memref<1x8x32xf32, #tpu.memory_space<vmem>>, vector<1x8x32xf32>
    %1 = vector.shape_cast %0 : vector<1x8x32xf32> to vector<8x32xf32>
    %2 = arith.truncf %1 : vector<8x32xf32> to vector<8x32xbf16>
    %c0_2 = arith.constant 0 : index
    %c0_3 = arith.constant 0 : index
    %c0_4 = arith.constant 0 : index
    %3 = vector.load %arg3[%c0_2, %c0_3, %c0_4] : memref<1x32x16xbf16, #tpu.memory_space<vmem>>, vector<1x32x16xbf16>
    %4 = vector.shape_cast %3 : vector<1x32x16xbf16> to vector<32x16xbf16>
    %cst = arith.constant dense<0.000000e+00> : vector<8x16xf32>
    %5 = tpu.matmul %2, %4, %cst {dimension_numbers = #tpu.dot_dimension_numbers<[1], [0], [0], [1], [0, 0, 1, 1], [], []>} : vector<8x32xbf16>, vector<32x16xbf16>, vector<8x16xf32> -> vector<8x16xf32>
    %c0_5 = arith.constant 0 : index
    %c0_6 = arith.constant 0 : index
    %c0_7 = arith.constant 0 : index
    %6 = vector.load %arg4[%c0_5, %c0_6, %c0_7] : memref<1x1x16xf32, #tpu.memory_space<vmem>>, vector<1x1x16xf32>
    %7 = vector.shape_cast %6 : vector<1x1x16xf32> to vector<1x16xf32>
    %8 = vector.broadcast %7 : vector<1x16xf32> to vector<8x16xf32>
    %9 = arith.addf %5, %8 : vector<8x16xf32>
    %cst_8 = arith.constant dense<0.000000e+00> : vector<8xf32>
    %10 = vector.multi_reduction <add>, %9, %cst_8 [1] : vector<8x16xf32> to vector<8xf32>
    %11 = vector.shape_cast %10 : vector<8xf32> to vector<8x1xf32>
    %cst_9 = arith.constant 1.600000e+01 : f32
    %12 = vector.broadcast %cst_9 : f32 to vector<8x1xf32>
    %13 = arith.divf %11, %12 : vector<8x1xf32>
    %14 = vector.broadcast %13 : vector<8x1xf32> to vector<8x16xf32>
    %15 = arith.subf %9, %14 : vector<8x16xf32>
    %16 = arith.mulf %15, %15 : vector<8x16xf32>
    %cst_10 = arith.constant dense<0.000000e+00> : vector<8xf32>
    %17 = vector.multi_reduction <add>, %16, %cst_10 [1] : vector<8x16xf32> to vector<8xf32>
    %18 = vector.shape_cast %17 : vector<8xf32> to vector<8x1xf32>
    %cst_11 = arith.constant 1.600000e+01 : f32
    %19 = vector.broadcast %cst_11 : f32 to vector<8x1xf32>
    %20 = arith.divf %18, %19 : vector<8x1xf32>
    %cst_12 = arith.constant 9.99999974E-6 : f32
    %21 = vector.broadcast %cst_12 : f32 to vector<8x1xf32>
    %22 = arith.addf %20, %21 : vector<8x1xf32>
    %23 = math.rsqrt %22 : vector<8x1xf32>
    %24 = vector.broadcast %23 : vector<8x1xf32> to vector<8x16xf32>
    %25 = arith.mulf %15, %24 : vector<8x16xf32>
    %cst_13 = arith.constant 0.000000e+00 : f32
    %26 = vector.broadcast %cst_13 : f32 to vector<8x16xf32>
    %27 = arith.maximumf %25, %26 : vector<8x16xf32>
    %c0_14 = arith.constant 0 : index
    %c0_15 = arith.constant 0 : index
    %c0_16 = arith.constant 0 : index
    %28 = vector.load %arg5[%c0_14, %c0_15, %c0_16] : memref<1x8x16xf32, #tpu.memory_space<vmem>>, vector<1x8x16xf32>
    %29 = vector.shape_cast %28 : vector<1x8x16xf32> to vector<8x16xf32>
    %30 = vector.shape_cast %27 : vector<8x16xf32> to vector<1x8x16xf32>
    tpu.vector_store %arg5[%c0_14, %c0_15, %c0_16], %30 {strides = array<i32>} : memref<1x8x16xf32, #tpu.memory_space<vmem>>, vector<1x8x16xf32>,
    return
  }
  func.func @transform_0(%arg0: i32, %arg1: i32) -> (i32, i32, i32) {
    %c0_i32 = arith.constant 0 : i32
    %c0_i32_0 = arith.constant 0 : i32
    return %arg0, %arg1, %c0_i32 : i32, i32, i32
  }
  func.func @transform_1(%arg0: i32, %arg1: i32) -> (i32, i32, i32) {
    %c0_i32 = arith.constant 0 : i32
    %c0_i32_0 = arith.constant 0 : i32
    %c0_i32_1 = arith.constant 0 : i32
    return %arg0, %c0_i32, %c0_i32_0 : i32, i32, i32
  }
  func.func @transform_2(%arg0: i32, %arg1: i32) -> (i32, i32, i32) {
    %c0_i32 = arith.constant 0 : i32
    %c0_i32_0 = arith.constant 0 : i32
    %c0_i32_1 = arith.constant 0 : i32
    return %arg0, %c0_i32, %c0_i32_0 : i32, i32, i32
  }
  func.func @transform_3(%arg0: i32, %arg1: i32) -> (i32, i32, i32) {
    %c0_i32 = arith.constant 0 : i32
    %c0_i32_0 = arith.constant 0 : i32
    return %arg0, %arg1, %c0_i32 : i32, i32, i32
  }
}

</mosaic_0001>

<bundles_post_ra>
// kernel: tpu_custom_call.1
= control target key start
LH: loop header
LB: loop body
LE: loop exit
PB: predicated region body
PF: predicated region fallthrough
CT: control target
= control target key end

     0   :  { %8 = vsyncpa [#allocation3], 0  ;;  %s733_s0 = inlined_call_operand.vmem [shape: f32[2,8,32], index: 0, kind: input, shape index: {}]   ;;  %s734_s1 = inlined_call_operand.vmem [shape: bf16[2,32,16], index: 1, kind: input, shape index: {}]   ;;  %s735_s2 = inlined_call_operand.vmem [shape: f32[2,1,16], index: 2, kind: input, shape index: {}]   ;;  %s736_s3 = inlined_call_operand.hbm [shape: f32[2,8,16], index: 3, kind: output, shape index: {}]  }
   0x1   :  { %10 = vsyncpa [#allocation3 + $0x1], 0  ;;  %s612_s12 = smov 0   ;;  %s614_s13 = smov 0  }
   0x2   :  { %s616_s14 = smov 0   ;;  %s618_s15 = smov 0  }
   0x3   :  { %s620_s16 = smov 0   ;;  %s622_s17 = smov 0  }
   0x4 LB: > { %s419_s18 = sadd.s32 4294967295, %s587_s17   ;;  %s420_s19 = sadd.s32 4294967294, %s587_s17   ;;  %s587_s17 = sphi %s622_s17, %s16_s17   ;;  %s583_s16 = sphi %s620_s16, %s743_s16   ;;  %s579_s15 = sphi %s618_s15, %s742_s15   ;;  %s575_s14 = sphi %s616_s14, %s741_s14   ;;  %s571_s13 = sphi %s614_s13, %s740_s13   ;;  %s567_s12 = sphi %s612_s12, %s739_s12  }
   0x5   : > { %s28_s20 = sadd.s32 1, %s583_s16  ;;  %s117_s21 = sadd.s32 1, %s575_s14 }
   0x6   : > { %p30_p0 = scmp.ge.s32.totalorder %s28_s20, 2  ;;  %p127_p1 = scmp.ne.s32.totalorder %s575_s14, %s571_s13 }
   0x7   : > { %p128_p2 = scmp.eq.s32.totalorder %s419_s18, 1  ;;  %p133_p3 = scmp.ne.s32.totalorder %s571_s13, %s567_s12 }
   0x8   : > { %s745_s20 = smov (%p30_p0, %s28_s20), 0  ;;  %p134_p5 = scmp.eq.s32.totalorder %s420_s19, 1 }
   0x9   : > { %p652_p4 = por %p128_p2, %p127_p1  ;;  %s112_s23 = ssub.s32 %s583_s16, %s745_s20 }
   0xa   : > { %p423_p6 = scmp.ge.s32.totalorder %s587_s17, 1  ;;  %p115_p7 = scmp.eq.s32.totalorder %s112_s23, 0 }
   0xb   : > { %p659_p8 = por %p134_p5, %p133_p3  ;;  %p176_p9 = scmp.lt.s32.totalorder %s587_s17, 3 }
   0xc   : > { %s665_s25 = scalar_select %p115_p7, %s575_s14, %s117_s21  }
   0xd   : > { %p177_p10 = pnand %p423_p6, %p176_p9 }
   0xe   : > { %p210_p11 = scmp.lt.s32.totalorder (!%p177_p10), %s579_s15, 1  ;;  %v589_v0 = vmov (!%p177_p10), 0.0   ;;  %vm590_vm0 = vmmov (!%p177_p10), 0   ;;  %vm251_vm1 = vcmask (!%p177_p10), 261120   ;;  %vm295_vm2 = vcmask (!%p177_p10), 130048   ;;  %s207_s11 = sand.u32 (!%p177_p10), 1, %s571_s13  }
   0xf   : > { %180 = sbr.rel (%p177_p10) target bundleno = 573 (0x23d), region = 32  ;;  %440 = vmatprep.subr.bf16.mxu0 (!%p177_p10), %v589_v0  ;;  %444 = vmatprep.mubr.msk.bf16.mxu0 (!%p177_p10), %vm590_vm0, %v589_v0  ;;  %s424_s18 = sshll.u32 (!%p177_p10), %s207_s11, 3 }
  0x10   : > { %s433_s19 = sshll.u32 (!%p177_p10), %s579_s15, 7  ;;  %s209_s21 = scalar_lea.vmem (!%p177_p10), [#allocation2], %s424_s18 }
  0x11   : > { %s327_s23 = sshll.u32 (!%p177_p10), %s209_s21, 4  ;;  %s313_s29 = scalar_lea.sflag (!%p177_p10), [#allocation3], %s207_s11  ;;  %s687_s23 = int_to_ptr.vmem [resolvable:$true] %s327_s23 }
  0x12   : > { %s509_s30 = scalar_lea.vmem (!%p177_p10), %s687_s23, 128 }
  0x13   : > { %p510_p12 = scmp.ne.s32.totalorder (!%p177_p10), %s687_s23, %s509_s30 }
  0x15   : > { %p511_p13 = pnand (!%p177_p10), %p510_p12, %p652_p4 }
  0x16   : > { %s211_s26 = scalar_select %p210_p11, %s579_s15, 1 }
  0x17   : > { %p512_p0 = pneg %p511_p13  ;;  %s591_s15 = smov [#allocation2]  }
  0x18   : > { %s436_s27 = sshll.u32 %s211_s26, 4  ;;  %s425_s28 = sshll.u32 %s211_s26, 3 }
  0x19   : > { %s221_s4 = scalar_lea.vmem %s734_s1, %s436_s27  ;;  %s216_s7 = scalar_lea.vmem %s733_s0, %s425_s28 }
  0x1a   : > { %v505_v1 = vld [vmem:[%s221_s4] sm:$0xff]   ;;  %v506_v2 = vld [vmem:[%s221_s4 + $0x8] sm:$0xff]   ;;  %s224_s10 = scalar_lea.vmem %s735_s2, %s211_s26  ;;  %s685_s28 = scalar_lea.hbm %s736_s3, %s433_s19 }
  0x1b   : > { %441 = vmatpush3.bf16.msra.mxu0 %v505_v1  ;;  %v226_v3 = vld [vmem:[%s216_s7] sm:$0xff]  ;;  %s513_s4 = sshll.u32 %s591_s15, 4  ;;  %s514_s4 = int_to_ptr.vmem [resolvable:$false] %s513_s4 }
  0x1c   : > { %442 = vmatprep.subr.bf16.mxu0 %v589_v0  ;;  %v227_v4 = vpack.c.bf16 %v226_v3, %v226_v3  ;;  %v428_v5 = vld [vmem:[%s224_s10] ss:$0 sm:$0xff]  ;;  %s515_s5 = scalar_lea.vmem %s514_s4, 256  ;;  %p516_p1 = scmp.lt.s32.totalorder %s687_s23, %s514_s4 }
  0x1d   : > { %p517_p2 = scmp.lt.s32.totalorder %s515_s5, %s509_s30 }
  0x1f   : > { %443 = vmatpush3.bf16.msra.mxu0 %v506_v2  ;;  %p518_p3 = por %p517_p2, %p516_p1 }
  0x21   : > { %p519_p5 = pnand %p518_p3, %p512_p0 }
  0x22   : > { %445 = vmatmul.mubr.msk.bf16.vlgmr.msra.gmra.mrb[0].mxu0 %vm251_vm1, %v227_v4 }
  0xf5   : > { %v289_v6 = vpop.f32.mrb[0].mxu0 }
  0xf6   : > { %v290_v7 = vadd.f32 %v428_v5, %v289_v6  ;;  %v446_v8 = vpop.f32.mrb[1].mxu0 }
  0xf7   : > { %v292_v9 = vpop.f32.mrb[2].mxu0 }
  0xf8   : > { %v447_v10 = vpop.f32.mrb[3].mxu0  ;;  %v296_v11 = vsel %vm295_vm2, %v290_v7, 0.0 }
  0xf9   : > { %297 = vadd.xlane.f32.xlu0 %v296_v11 }
 0x186   : > { %v298_v12 = vpop.xlane.xlu0 %297 }
 0x187   : > { %v300_v13 = vmul.f32 0.0625, %v298_v12 }
 0x189   : > { %v301_v14 = vsub.f32 %v290_v7, %v300_v13 }
 0x18b   : > { %v302_v15 = vmul.f32 %v301_v14, %v301_v14 }
 0x18d   : > { %v303_v16 = vsel %vm295_vm2, %v302_v15, 0.0 }
 0x18e   : > { %304 = vadd.xlane.f32.xlu0 %v303_v16 }
 0x21b   : > { %v305_v17 = vpop.xlane.xlu0 %304 }
 0x21c   : > { %v306_v18 = vmul.f32 0.0625, %v305_v17 }
 0x21e   : > { %v307_v19 = vadd.f32 1e-05, %v306_v18 }
 0x220   : > { %507 = vrsqrt.f32 %v307_v19 }
 0x22a   : > { %v508_v20 = vpop.eup %507 }
 0x22b   : > { %v309_v21 = vmul.f32 %v508_v20, %v301_v14 }
 0x22d   : > { %v310_v22 = vmax.f32 %v309_v21, 0.0 }
 0x22f   : > { %311 = vst.msk [vmem:[%s209_s21] sm:$0xff] %vm295_vm2, %v310_v22 }
 0x230   : > { %522 = shalt.err (!%p519_p5)
}
 0x231   : > { %s523_s6 = scalar_lea.hbm %s685_s28, 128  ;;  %s527_s9 = scalar_lea.hbm %s736_s3, 256 }
 0x232   : > { %p524_p6 = scmp.ne.s32.totalorder %s685_s28, %s523_s6  ;;  %p528_p10 = scmp.lt.u32.totalorder %s685_s28, %s736_s3 }
 0x233   : > { %p529_p11 = scmp.lt.u32.totalorder %s527_s9, %s523_s6  ;;  %p531_p13 = scmp.lt.u32.totalorder %s523_s6, %s685_s28 }
 0x234   : > { %p525_p7 = pnand %p524_p6, %p652_p4 }
 0x235   : > { %p530_p12 = por %p529_p11, %p528_p10 }
 0x236   : > { %p526_p9 = pneg %p525_p7 }
 0x237   : > { %p532_p0 = por %p531_p13, %p530_p12 }
 0x239   : > { %p533_p1 = pnand %p532_p0, %p526_p9 }
 0x23b   : > { %536 = shalt.err (!%p533_p1)
}
 0x23c   : > { %448 = dma.vmem_to_hbm [thread:$0]  (%p652_p4), %s687_s23, 128, %s685_s28, %s313_s29  }
 0x23d PF: > { %p454_p2 = scmp.ge.s32.totalorder %s587_s17, 2  ;;  %s339_s18 = sand.u32 1, %s567_s12  }
 0x23e   : > { %s340_s19 = scalar_lea.sflag [#allocation3], %s339_s18 }
 0x23f   : > { %p451_p3 = pnand %p454_p2, %p659_p8 }
 0x241   : > { %562 = dma.done.wait (!%p451_p3), %s340_s19, 128  }
 0x242   : > { %564 = vsyncadd (!%p451_p3), %s340_s19, 4294967168  ;;  %s16_s17 = sadd.s32 1, %s587_s17   ;;  %s739_s12 = smov %s571_s13 }
 0x243   : > { %p13_p5 = scmp.ge.s32.totalorder %s16_s17, 4   ;;  %s740_s13 = smov %s575_s14 }
 0x244   : > { %s741_s14 = smov %s665_s25  ;;  %s742_s15 = smov %s583_s16 }
 0x245   : > { %s743_s16 = smov %s745_s20  ;;  %15 = sbr.rel (!%p13_p5) target bundleno = 4 (0x4), region = 73 }
 0x24c   :  { %345 = vsyncpa [#allocation3], 1 }
 0x24d   :  { %347 = vsyncpa [#allocation3 + $0x1], 1 }

</bundles_post_ra>
